<compile_context>
chip_gen: v7x
topology: tpu7x:2x2x1
jax: 0.10.0
libtpu: 0.0.40
codegen_flags: <defaults>
</compile_context>

<pallas_src>
import jax
import jax.numpy as jnp
from jax.experimental import pallas as pl
from jax.experimental.pallas import tpu as pltpu

_SQRT_HALF = 0.7071067811865476


def _cdiv(a, b):
    return -(-a // b)


def _round_up(v, n):
    return _cdiv(v, n) * n


def _gelu_exact(h):
    return 0.5 * h * (1.0 + jax.lax.erf(h * jnp.float32(_SQRT_HALF)))


# ----------------------------------------------------------------------------- kernels
def _ffn_kernel_f32_out(x_ref, w1_ref, b1_ref, w2_ref, b2_ref, o_ref):
    """f32 output: accumulate partial sums directly into the resident output block."""
    j = pl.program_id(1)

    @pl.when(j == 0)
    def _():
        o_ref[...] = jnp.broadcast_to(b2_ref[...], o_ref.shape)

    # dense1: bf16 operands, f32 MXU accumulation; bias + exact GELU in f32.
    h = jnp.dot(x_ref[...].astype(w1_ref.dtype), w1_ref[...],
                preferred_element_type=jnp.float32)
    h = _gelu_exact(h + b1_ref[...])
    # dense2 partial sum for this intermediate tile; dropout p=0.0 is the identity.
    o_ref[...] += jnp.dot(h.astype(w2_ref.dtype), w2_ref[...],
                          preferred_element_type=jnp.float32)


def _ffn_kernel_scratch(x_ref, w1_ref, b1_ref, w2_ref, b2_ref, o_ref, acc_ref):
    """Non-f32 output: f32 scratch accumulator; last partial + bias + cast fused."""
    j = pl.program_id(1)
    nj = pl.num_programs(1)

    @pl.when(j == 0)
    def _():
        acc_ref[...] = jnp.zeros_like(acc_ref)

    h = jnp.dot(x_ref[...].astype(w1_ref.dtype), w1_ref[...],
                preferred_element_type=jnp.float32)
    h = _gelu_exact(h + b1_ref[...])
    partial = jnp.dot(h.astype(w2_ref.dtype), w2_ref[...],
                      preferred_element_type=jnp.float32)

    @pl.when(j < nj - 1)
    def _():
        acc_ref[...] += partial

    @pl.when(j == nj - 1)
    def _():
        # dropout with p=0.0 is the identity -> bias add, cast, store in one pass.
        o_ref[...] = (acc_ref[...] + partial + b2_ref[...]).astype(o_ref.dtype)


# ----------------------------------------------------------------------------- wrapper
def _vmem_capacity_bytes():
    try:
        return int(pltpu.get_tpu_info().vmem_capacity_bytes)
    except Exception:
        return 64 * 1024 * 1024  # conservative default: v7x per-TensorCore VMEM


def prepare_ffn_params(w1, b1, w2, b2, *, tile_k=512, compute_dtype=jnp.bfloat16):
    """One-time parameter prep: bf16 cast + intermediate-dim padding (done once,
    NOT per forward call).  Weights are stored (in, out) like nn.Linear.T."""
    w1 = jnp.asarray(w1)
    w2 = jnp.asarray(w2)
    b1 = jnp.asarray(b1).reshape(1, -1)
    b2 = jnp.asarray(b2).reshape(1, -1)
    in_size, inter = w1.shape
    out_size = w2.shape[1]

    if inter <= tile_k:
        tk = inter
    else:
        tk = max(128, (tile_k // 128) * 128)     # tile must be a multiple of 128
    inter_p = _round_up(inter, tk)
    if inter_p != inter:
        # Exact: GELU(0)=0 and the padded W2 rows are zero.
        w1 = jnp.pad(w1, ((0, 0), (0, inter_p - inter)))
        b1 = jnp.pad(b1, ((0, 0), (0, inter_p - inter)))
        w2 = jnp.pad(w2, ((0, inter_p - inter), (0, 0)))

    return dict(
        w1=w1.astype(compute_dtype),
        b1=b1.astype(jnp.float32),
        w2=w2.astype(compute_dtype),
        b2=b2.astype(jnp.float32),
        tile_k=tk, in_size=in_size, inter_padded=inter_p, out_size=out_size)


def ffn_forward(x, params, *, tile_m=None):
    """x: (..., in_size). Returns (..., out_size) in x.dtype."""
    w1, b1, w2, b2 = params["w1"], params["b1"], params["w2"], params["b2"]
    tk = params["tile_k"]
    in_size = params["in_size"]
    inter_p = params["inter_padded"]
    out_size = params["out_size"]

    orig_shape = x.shape
    out_dtype = x.dtype
    x2d = x.reshape(-1, in_size)
    m = x2d.shape[0]

    # ---- generation-aware tile / VMEM budget selection.
    cap = _vmem_capacity_bytes()
    budget = int(cap * 0.8)                       # headroom for compiler scratch
    if tile_m is None:
        tile_m = 1024 if cap >= 100 * 1024 * 1024 else 512   # v5e/v6e vs v7x

    # ---- M tiling: minimize padding; even out tile count for megacore when each
    #      half still keeps enough weight reuse (>=256 rows).
    ntiles = _cdiv(m, tile_m)
    if ntiles % 2 == 1:
        alt_tm = _round_up(_cdiv(m, ntiles + 1), 8)
        if alt_tm >= 256:
            ntiles += 1
    tm = _round_up(_cdiv(m, ntiles), 8)

    x_bytes = jnp.dtype(x.dtype).itemsize
    w_bytes = jnp.dtype(w1.dtype).itemsize
    o_bytes = jnp.dtype(out_dtype).itemsize
    use_f32_out = (out_dtype == jnp.float32)

    def vmem_est(tm_):
        acc = 0 if use_f32_out else tm_ * out_size * 4
        return (2 * tm_ * in_size * x_bytes       # x tile (double-buffered)
                + 2 * in_size * tk * w_bytes      # W1 tile
                + 2 * tk * 4                      # b1 tile
                + 2 * tk * out_size * w_bytes     # W2 tile
                + 2 * out_size * 4                # b2
                + 2 * tm_ * out_size * o_bytes    # out tile
                + acc)                            # f32 accumulator (non-f32 out)

    # Shrink the M tile (never tk, which is fixed at prepare time) until it fits.
    while vmem_est(tm) > budget and tm > 8:
        tm = max(8, _round_up(tm // 2, 8))

    ntiles = _cdiv(m, tm)
    m_padded = ntiles * tm
    pad_m = m_padded - m
    if pad_m:
        # At most a handful of rows thanks to the ntiles-first tm choice.
        # TODO(synk): a masked store for the ragged last M tile would avoid this copy.
        x2d = jnp.pad(x2d, ((0, pad_m), (0, 0)))

    grid = (ntiles, inter_p // tk)
    vmem_limit = int(min(max(int(1.5 * vmem_est(tm)), 32 * 1024 * 1024), budget))

    cost = pl.CostEstimate(
        flops=2 * m * in_size * inter_p + 2 * m * inter_p * out_size,
        transcendentals=m * inter_p,
        bytes_accessed=int(m * in_size * x_bytes
                           + ntiles * (in_size * inter_p + inter_p * out_size) * w_bytes
                           + inter_p * 4 + out_size * 4
                           + m * out_size * o_bytes),
    )

    if use_f32_out:
        kernel = _ffn_kernel_f32_out
        scratch_shapes = ()
    else:
        kernel = _ffn_kernel_scratch
        scratch_shapes = (pltpu.VMEM((tm, out_size), jnp.float32),)

    out2d = pl.pallas_call(
        kernel,
        out_shape=jax.ShapeDtypeStruct((m_padded, out_size), out_dtype),
        grid_spec=pltpu.PrefetchScalarGridSpec(
            num_scalar_prefetch=0,
            grid=grid,
            in_specs=[
                pl.BlockSpec((tm, in_size), lambda i, j: (i, 0)),     # x tile
                pl.BlockSpec((in_size, tk), lambda i, j: (0, j)),     # W1 tile
                pl.BlockSpec((1, tk), lambda i, j: (0, j)),           # b1 tile
                pl.BlockSpec((tk, out_size), lambda i, j: (j, 0)),    # W2 tile
                pl.BlockSpec((1, out_size), lambda i, j: (0, 0)),     # b2
            ],
            out_specs=pl.BlockSpec((tm, out_size), lambda i, j: (i, 0)),
            scratch_shapes=scratch_shapes,
        ),
        compiler_params=pltpu.CompilerParams(
            dimension_semantics=("parallel", "arbitrary"),
            vmem_limit_bytes=vmem_limit),
        cost_estimate=cost,
    )(x2d, w1, b1, w2, b2)

    if pad_m:
        out2d = out2d[:m]
    return out2d.reshape(*orig_shape[:-1], out_size)


def init_ffn_params(key, in_size, out_size, intermediate_size):
    """Deterministic parameter init matching nn.Linear shapes (stored as (in, out))."""
    k1, k2, k3, k4 = jax.random.split(key, 4)
    bound1 = 1.0 / jnp.sqrt(in_size)
    w1 = jax.random.uniform(k1, (in_size, intermediate_size),
                            minval=-bound1, maxval=bound1, dtype=jnp.float32)
    b1 = jax.random.uniform(k2, (1, intermediate_size),
                            minval=-bound1, maxval=bound1, dtype=jnp.float32)
    bound2 = 1.0 / jnp.sqrt(intermediate_size)
    w2 = jax.random.uniform(k3, (intermediate_size, out_size),
                            minval=-bound2, maxval=bound2, dtype=jnp.float32)
    b2 = jax.random.uniform(k4, (1, out_size),
                            minval=-bound2, maxval=bound2, dtype=jnp.float32)
    return w1, b1, w2, b2


if __name__ == "__main__":
    # Small shapes implied by the forward: (batch, seq, in_size) token features.
    batch, seq = 2, 8
    in_size, intermediate_size, out_size = 32, 64, 32

    key = jax.random.PRNGKey(0)
    kx, kp = jax.random.split(key)
    x = jax.random.normal(kx, (batch, seq, in_size), dtype=jnp.float32)
    w1, b1, w2, b2 = init_ffn_params(kp, in_size, out_size, intermediate_size)

    # One-time parameter prep (bf16 cast + intermediate padding) outside the forward.
    params = prepare_ffn_params(w1, b1, w2, b2)

    out = ffn_forward(x, params)
    out = jax.block_until_ready(out)
    assert out.shape == (batch, seq, out_size)

    def gelu(v):
        return 0.5 * v * (1.0 + jax.lax.erf(v / jnp.sqrt(2.0)))

    # Reference matching the kernel's bf16-matmul / f32-accumulate recipe.
    xb = x.reshape(-1, in_size).astype(jnp.bfloat16)
    h_b = jnp.dot(xb, w1.astype(jnp.bfloat16),
                  preferred_element_type=jnp.float32) + b1
    h_b = gelu(h_b)
    ref_b = (jnp.dot(h_b.astype(jnp.bfloat16), w2.astype(jnp.bfloat16),
                     preferred_element_type=jnp.float32) + b2
             ).reshape(batch, seq, out_size)
    assert jnp.allclose(out, ref_b, atol=2e-3, rtol=2e-3), \
        float(jnp.max(jnp.abs(out - ref_b)))

    # Loose check against the exact f32 PyTorch semantics (bf16 rounding only).
    ref_f = gelu(x @ w1 + b1) @ w2 + b2
    assert jnp.allclose(out, ref_f, atol=5e-2, rtol=5e-2), \
        float(jnp.max(jnp.abs(out - ref_f)))

    # Exercise the non-f32-output (scratch-accumulator) kernel path with bf16 x.
    out_bf16 = jax.block_until_ready(ffn_forward(x.astype(jnp.bfloat16), params))
    assert out_bf16.dtype == jnp.bfloat16
    assert jnp.allclose(out_bf16.astype(jnp.float32), ref_b, atol=3e-2, rtol=3e-2), \
        float(jnp.max(jnp.abs(out_bf16.astype(jnp.float32) - ref_b)))

    print("KERNEL_OK")
</pallas_src>

<mosaic_0001>
module attributes {stable_mosaic.version = 11 : i64} {
  func.func @_ffn_kernel_f32_out(%arg0: i32, %arg1: i32, %arg2: memref<16x32xf32, #tpu.memory_space<vmem>>, %arg3: memref<32x64xbf16, #tpu.memory_space<vmem>>, %arg4: memref<1x64xf32, #tpu.memory_space<vmem>>, %arg5: memref<64x32xbf16, #tpu.memory_space<vmem>>, %arg6: memref<1x32xf32, #tpu.memory_space<vmem>>, %arg7: memref<16x32xf32, #tpu.memory_space<vmem>>) attributes {dimension_semantics = [#tpu.dimension_semantics<parallel>, #tpu.dimension_semantics<arbitrary>], iteration_bounds = array<i64: 1, 1>, scalar_prefetch = 0 : i64, scratch_operands = 0 : i64, tpu.core_type = #tpu.core_type<tc>, window_params = [{transform_indices = @transform_0, window_bounds = array<i64: 16, 32>}, {transform_indices = @transform_1, window_bounds = array<i64: 32, 64>}, {transform_indices = @transform_2, window_bounds = array<i64: 1, 64>}, {transform_indices = @transform_3, window_bounds = array<i64: 64, 32>}, {pipeline_mode = #tpu.pipeline_mode<synchronous>, transform_indices = @transform_4, window_bounds = array<i64: 1, 32>}, {transform_indices = @transform_5, window_bounds = array<i64: 16, 32>}]} {
    %c0_i32 = arith.constant 0 : i32
    %0 = arith.cmpi eq, %arg1, %c0_i32 : i32
    %1 = arith.extui %0 : i1 to i32
    %c0_i32_0 = arith.constant 0 : i32
    %2 = arith.cmpi ne, %1, %c0_i32_0 : i32
    scf.if %2 {
      %c0_16 = arith.constant 0 : index
      %c0_17 = arith.constant 0 : index
      %24 = vector.load %arg6[%c0_16, %c0_17] : memref<1x32xf32, #tpu.memory_space<vmem>>, vector<1x32xf32>
      %25 = vector.shape_cast %24 : vector<1x32xf32> to vector<1x32xf32>
      %26 = vector.broadcast %25 : vector<1x32xf32> to vector<16x32xf32>
      %c0_18 = arith.constant 0 : index
      %c0_19 = arith.constant 0 : index
      %27 = vector.load %arg7[%c0_18, %c0_19] : memref<16x32xf32, #tpu.memory_space<vmem>>, vector<16x32xf32>
      tpu.vector_store %arg7[%c0_18, %c0_19], %26 {strides = array<i32>} : memref<16x32xf32, #tpu.memory_space<vmem>>, vector<16x32xf32>,
    } else {
    }
    %c0 = arith.constant 0 : index
    %c0_1 = arith.constant 0 : index
    %3 = vector.load %arg2[%c0, %c0_1] : memref<16x32xf32, #tpu.memory_space<vmem>>, vector<16x32xf32>
    %4 = arith.truncf %3 : vector<16x32xf32> to vector<16x32xbf16>
    %c0_2 = arith.constant 0 : index
    %c0_3 = arith.constant 0 : index
    %5 = vector.load %arg3[%c0_2, %c0_3] : memref<32x64xbf16, #tpu.memory_space<vmem>>, vector<32x64xbf16>
    %cst = arith.constant dense<0.000000e+00> : vector<16x64xf32>
    %6 = tpu.matmul %4, %5, %cst {dimension_numbers = #tpu.dot_dimension_numbers<[1], [0], [0], [1], [0, 0, 1, 1], [], []>} : vector<16x32xbf16>, vector<32x64xbf16>, vector<16x64xf32> -> vector<16x64xf32>
    %c0_4 = arith.constant 0 : index
    %c0_5 = arith.constant 0 : index
    %7 = vector.load %arg4[%c0_4, %c0_5] : memref<1x64xf32, #tpu.memory_space<vmem>>, vector<1x64xf32>
    %8 = vector.broadcast %7 : vector<1x64xf32> to vector<16x64xf32>
    %9 = arith.addf %6, %8 : vector<16x64xf32>
    %cst_6 = arith.constant 5.000000e-01 : f32
    %10 = vector.broadcast %cst_6 : f32 to vector<16x64xf32>
    %11 = arith.mulf %10, %9 : vector<16x64xf32>
    %cst_7 = arith.constant 0.707106769 : f32
    %12 = vector.broadcast %cst_7 : f32 to vector<16x64xf32>
    %13 = arith.mulf %9, %12 : vector<16x64xf32>
    %14 = math.erf %13 : vector<16x64xf32>
    %cst_8 = arith.constant 1.000000e+00 : f32
    %15 = vector.broadcast %cst_8 : f32 to vector<16x64xf32>
    %16 = arith.addf %15, %14 : vector<16x64xf32>
    %17 = arith.mulf %11, %16 : vector<16x64xf32>
    %c0_9 = arith.constant 0 : index
    %c0_10 = arith.constant 0 : index
    %18 = vector.load %arg7[%c0_9, %c0_10] : memref<16x32xf32, #tpu.memory_space<vmem>>, vector<16x32xf32>
    %19 = arith.truncf %17 : vector<16x64xf32> to vector<16x64xbf16>
    %c0_11 = arith.constant 0 : index
    %c0_12 = arith.constant 0 : index
    %20 = vector.load %arg5[%c0_11, %c0_12] : memref<64x32xbf16, #tpu.memory_space<vmem>>, vector<64x32xbf16>
    %cst_13 = arith.constant dense<0.000000e+00> : vector<16x32xf32>
    %21 = tpu.matmul %19, %20, %cst_13 {dimension_numbers = #tpu.dot_dimension_numbers<[1], [0], [0], [1], [0, 0, 1, 1], [], []>} : vector<16x64xbf16>, vector<64x32xbf16>, vector<16x32xf32> -> vector<16x32xf32>
    %22 = arith.addf %18, %21 : vector<16x32xf32>
    %c0_14 = arith.constant 0 : index
    %c0_15 = arith.constant 0 : index
    %23 = vector.load %arg7[%c0_14, %c0_15] : memref<16x32xf32, #tpu.memory_space<vmem>>, vector<16x32xf32>
    tpu.vector_store %arg7[%c0_14, %c0_15], %22 {strides = array<i32>} : memref<16x32xf32, #tpu.memory_space<vmem>>, vector<16x32xf32>,
    return
  }
  func.func @transform_0(%arg0: i32, %arg1: i32) -> (i32, i32) {
    %c0_i32 = arith.constant 0 : i32
    %c0_i32_0 = arith.constant 0 : i32
    return %arg0, %c0_i32 : i32, i32
  }
  func.func @transform_1(%arg0: i32, %arg1: i32) -> (i32, i32) {
    %c0_i32 = arith.constant 0 : i32
    %c0_i32_0 = arith.constant 0 : i32
    return %c0_i32, %arg1 : i32, i32
  }
  func.func @transform_2(%arg0: i32, %arg1: i32) -> (i32, i32) {
    %c0_i32 = arith.constant 0 : i32
    %c0_i32_0 = arith.constant 0 : i32
    return %c0_i32, %arg1 : i32, i32
  }
  func.func @transform_3(%arg0: i32, %arg1: i32) -> (i32, i32) {
    %c0_i32 = arith.constant 0 : i32
    %c0_i32_0 = arith.constant 0 : i32
    return %arg1, %c0_i32 : i32, i32
  }
  func.func @transform_4(%arg0: i32, %arg1: i32) -> (i32, i32) {
    %c0_i32 = arith.constant 0 : i32
    %c0_i32_0 = arith.constant 0 : i32
    %c0_i32_1 = arith.constant 0 : i32
    return %c0_i32, %c0_i32_0 : i32, i32
  }
  func.func @transform_5(%arg0: i32, %arg1: i32) -> (i32, i32) {
    %c0_i32 = arith.constant 0 : i32
    %c0_i32_0 = arith.constant 0 : i32
    return %arg0, %c0_i32 : i32, i32
  }
}

</mosaic_0001>

<bundles_post_ra>
// kernel: tpu_custom_call.1
= control target key start
LH: loop header
LB: loop body
LE: loop exit
PB: predicated region body
PF: predicated region fallthrough
CT: control target
= control target key end

     0   :  { %v294_v1 = vmov 0.0   ;;  %vm295_vm0 = vmmov 0   ;;  %s376_s0 = inlined_call_operand.vmem [shape: f32[16,32], index: 0, kind: input, shape index: {}]   ;;  %s377_s1 = inlined_call_operand.vmem [shape: bf16[32,64], index: 1, kind: input, shape index: {}]   ;;  %s378_s2 = inlined_call_operand.vmem [shape: f32[1,64], index: 2, kind: input, shape index: {}]   ;;  %s379_s3 = inlined_call_operand.vmem [shape: bf16[64,32], index: 3, kind: input, shape index: {}]   ;;  %s380_s4 = inlined_call_operand.vmem [shape: f32[1,32], index: 4, kind: input, shape index: {}]   ;;  %s381_s5 = inlined_call_operand.hbm [shape: f32[16,32], index: 5, kind: output, shape index: {}]  }
   0x1   :  { %v260_v0 = vld [vmem:[%s377_s1] sm:$0xff]   ;;  %235 = vmatprep.subr.bf16.mxu0 %v294_v1  ;;  %243 = vmatprep.subr.bf16.mxu1 %v294_v1  ;;  %v261_v2 = vld [vmem:[%s377_s1 + $0x8] sm:$0xff]  }
   0x2   :  { %236 = vmatpush3.bf16.msra.mxu0 %v260_v0  ;;  %239 = vmatprep.mubr.msk.bf16.mxu0 %vm295_vm0, %v294_v1  ;;  %v36_v3 = vld [vmem:[%s376_s0] sm:$0xff]  ;;  %v37_v4 = vld [vmem:[%s376_s0 + $0x8] sm:$0xff] }
   0x3   :  { %237 = vmatprep.subr.bf16.mxu0 %v294_v1  ;;  %251 = vmatprep.mubr.msk.bf16.mxu1 %vm295_vm0, %v294_v1  ;;  %v38_v5 = vpack.c.bf16 %v37_v4, %v36_v3 }
   0x4   :  { %10 = vsyncpa [#allocation3], 0  ;;  %vm33_vm1 = vcmask 261120   ;;  %v262_v6 = vld [vmem:[%s379_s3] sm:$0xff]   ;;  %v263_v7 = vld [vmem:[%s379_s3 + $0x8] sm:$0xff]   ;;  %vm152_vm2 = vcmask 523264  }
   0x5   :  { %244 = vmatpush3.bf16.msra.mxu1 %v262_v6  ;;  %v264_v8 = vld [vmem:[%s379_s3 + $0x10] sm:$0xff]   ;;  %v265_v9 = vld [vmem:[%s379_s3 + $0x18] sm:$0xff]   ;;  %v217_v10 = vld [vmem:[%s380_s4] ss:$0 sm:$0xff] }
   0x6   :  { %238 = vmatpush3.bf16.msra.mxu0 %v261_v2  ;;  %245 = vmatprep.subr.bf16.mxu1 %v294_v1  ;;  %34 = vst.msk [vmem:[#allocation2] sm:$0xff] %vm33_vm1, %v217_v10  ;;  %35 = vst.msk [vmem:[#allocation2 + $0x8] sm:$0xff] %vm33_vm1, %v217_v10  ;;  %v218_v11 = vld [vmem:[%s378_s2] ss:$0 sm:$0xff]  ;;  %s296_s2 = smov [#allocation2]  }
   0x7   :  { %s206_s3 = sshll.u32 %s296_s2, 4  ;;  %s207_s3 = int_to_ptr.vmem [resolvable:$true] %s206_s3 }
   0x8   :  { %s270_s4 = scalar_lea.vmem %s207_s3, 256  ;;  %p275_p1 = scmp.lt.s32.totalorder %s207_s3, %s207_s3 }
   0x9   :  { %240 = vmatmul.mubr.msk.bf16.vlgmr.msra.gmra.mrb[0].mxu0 %vm33_vm1, %v38_v5  ;;  %246 = vmatpush3.bf16.msra.mxu1 %v263_v7  ;;  %p271_p0 = scmp.ne.s32.totalorder %s207_s3, %s270_s4  ;;  %p276_p2 = scmp.lt.s32.totalorder %s270_s4, %s270_s4 }
   0xa   :  { %247 = vmatprep.subr.bf16.mxu1 %v294_v1 }
   0xb   :  { %p277_p3 = por %p276_p2, %p275_p1 }
   0xd   :  { %248 = vmatpush3.bf16.msra.mxu1 %v264_v8  ;;  %v117_v29 = vld [vmem:[#allocation2] sm:$0xff]  ;;  %v118_v31 = vld [vmem:[#allocation2 + $0x8] sm:$0xff]  ;;  %p278_p4 = pnand %p277_p3, %p271_p0 }
   0xe   :  { %249 = vmatprep.subr.bf16.mxu1 %v294_v1 }
  0x11   :  { %250 = vmatpush3.bf16.msra.mxu1 %v265_v9 }
  0xdc   :  { %v100_v12 = vpop.f32.mrb[0].mxu0 }
  0xdd   :  { %v101_v13 = vadd.f32 %v218_v11, %v100_v12  ;;  %v241_v14 = vpop.f32.mrb[1].mxu0 }
  0xde   :  { %v103_v15 = vpop.f32.mrb[2].mxu0 }
  0xdf   :  { %v109_v16 = vmul.f32 0.70710677, %v101_v13  ;;  %v104_v17 = vadd.f32 %v218_v11, %v103_v15  ;;  %v242_v18 = vpop.f32.mrb[3].mxu0  ;;  %v107_v23 = vmul.f32 0.5, %v101_v13 }
  0xe1   :  { %266 = verf.f32 %v109_v16  ;;  %v110_v19 = vmul.f32 0.70710677, %v104_v17  ;;  %v108_v24 = vmul.f32 0.5, %v104_v17 }
  0xe3   :  { %268 = verf.f32 %v110_v19 }
  0xeb   :  { %v267_v20 = vpop.eup %266 }
  0xec   :  { %v113_v21 = vadd.f32 1.0, %v267_v20 }
  0xed   :  { %v269_v22 = vpop.eup %268 }
  0xee   :  { %v114_v25 = vadd.f32 1.0, %v269_v22  ;;  %v115_v26 = vmul.f32 %v113_v21, %v107_v23 }
  0xf0   :  { %v116_v27 = vmul.f32 %v114_v25, %v108_v24 }
  0xf2   :  { %v119_v28 = vpack.c.bf16 %v116_v27, %v115_v26 }
  0xf4   :  { %252 = vmatmul.mubr.msk.bf16.vlgmr.msra.gmra.mrb[0].mxu1 %vm152_vm2, %v119_v28 }
 0x1c7   :  { %v190_v30 = vpop.f32.mrb[0].mxu1 }
 0x1c8   :  { %v197_v32 = vadd.f32 %v190_v30, %v117_v29  ;;  %v253_v33 = vpop.f32.mrb[1].mxu1 }
 0x1c9   :  { %v193_v34 = vpop.f32.mrb[2].mxu1 }
 0x1ca   :  { %199 = vst.msk [vmem:[#allocation2] sm:$0xff] %vm33_vm1, %v197_v32  ;;  %v198_v35 = vadd.f32 %v193_v34, %v118_v31  ;;  %v254_v36 = vpop.f32.mrb[3].mxu1 }
 0x1cc   :  { %200 = vst.msk [vmem:[#allocation2 + $0x8] sm:$0xff] %vm33_vm1, %v198_v35 }
 0x1cd   :  { %281 = shalt.err (!%p278_p4)
}
 0x1ce   :  { %s282_s13 = scalar_lea.hbm %s381_s5, 256 }
 0x1cf   :  { %p283_p5 = scmp.ne.s32.totalorder %s381_s5, %s282_s13  ;;  %p286_p6 = scmp.lt.u32.totalorder %s282_s13, %s381_s5 }
 0x1d1   :  { %p288_p7 = pnand %p286_p6, %p283_p5 }
 0x1d3   :  { %291 = shalt.err (!%p288_p7)
}
 0x1d4   :  { %s297_s18 = smov 128   ;;  %s298_s19 = smov 8  }
 0x1d5   :  { %212 = dma.vmem_to_hbm [thread:$0]  %s207_s3, 256, %s381_s5, [#allocation3], %s297_s18, %s297_s18, %s298_s19  }
 0x1d6   :  { %292 = dma.done.wait [#allocation3], 256  }
 0x1d7   :  { %293 = vsyncadd [#allocation3], 4294967040 }
 0x1d8   :  { %216 = vsyncpa [#allocation3], 1 }

</bundles_post_ra>
